<compile_context>
chip_gen: v5e
topology: v5e:2x2
jax: 0.10.0
libtpu: 0.0.40
codegen_flags: <defaults>
</compile_context>

<pallas_src>
import functools

import jax
import jax.numpy as jnp
from jax import lax
from jax.experimental import pallas as pl
from jax.experimental.pallas import tpu as pltpu

_EPS = 1e-12  # torch F.normalize default eps
_INV_SQRT2 = 0.7071067811865476


def _cdiv(a, b):
    return -(-a // b)


def _vmem_limit_bytes():
    """Generation-aware VMEM budget (leaves headroom for Mosaic scratch)."""
    try:
        cap = pltpu.get_tpu_info().vmem_capacity_bytes
        return min(int(cap * 0.85), 112 * 1024 * 1024)
    except Exception:
        return 48 * 1024 * 1024  # conservative; fits every TPU generation


def _choose_hidden_block(hidden, max_block=2048):
    """Largest lane-aligned divisor of `hidden` <= max_block; else no chunking."""
    if hidden <= max_block:
        return hidden
    for cand in range(max_block, 127, -128):
        if hidden % cand == 0:
            return cand
    return hidden  # fallback: single chunk (always correct)


# ---------------------------------------------------------------------------
# One-shot weight parametrization kernel (runs once per forward; cacheable).
# Input is the transposed torch weight [in_features, out_features]; the L1
# normalization of relu(W) over torch's dim=-1 (the input dim) is axis 0 here,
# so tiling over the output-column axis keeps the reduction exact.
# ---------------------------------------------------------------------------
def _positive_norm_t_kernel(w_ref, o_ref):
    w = jnp.maximum(w_ref[...].astype(jnp.float32), 0.0)
    s = jnp.maximum(jnp.sum(w, axis=0, keepdims=True), _EPS)
    o_ref[...] = (w / s).astype(o_ref.dtype)


def _positive_norm_t(w_t, out_dtype, vmem_limit):
    rows, cols = w_t.shape
    tn = 512 if (cols > 1024 and cols % 512 == 0) else cols
    return pl.pallas_call(
        _positive_norm_t_kernel,
        out_shape=jax.ShapeDtypeStruct((rows, cols), out_dtype),
        grid=(cols // tn,),
        in_specs=[pl.BlockSpec((rows, tn), lambda j: (0, j))],
        out_specs=pl.BlockSpec((rows, tn), lambda j: (0, j)),
        compiler_params=pltpu.CompilerParams(
            dimension_semantics=("parallel",),
            vmem_limit_bytes=vmem_limit,
        ),
    )(w_t)


# ---------------------------------------------------------------------------
# Main MLP kernel: one [tile_m, D_in] activation tile per grid step, both
# (pre-normalized) weights resident in VMEM.  x is cast in-VMEM to the weight
# dtype; matmuls accumulate in f32.  The hidden dim is processed in static
# chunks so the live f32 intermediate stays small at large H.
# ---------------------------------------------------------------------------
def _mlp_kernel(x_ref, w1_ref, w2_ref, o_ref, *, h_block):
    x = x_ref[...].astype(w1_ref.dtype)          # in-kernel cast (no HBM pass)
    hidden = w1_ref.shape[1]
    n_chunks = hidden // h_block

    def chunk(c):
        lo, hi = c * h_block, (c + 1) * h_block
        h = jnp.dot(x, w1_ref[:, lo:hi], preferred_element_type=jnp.float32)
        # exact (erf) GELU in f32, matching torch nn.GELU() default numerics
        h = 0.5 * h * (1.0 + lax.erf(h * jnp.float32(_INV_SQRT2)))
        # drop1: p = 0.0 -> identity
        return jnp.dot(h.astype(w2_ref.dtype), w2_ref[lo:hi, :],
                       preferred_element_type=jnp.float32)

    y = chunk(0)
    for c in range(1, n_chunks):
        y = y + chunk(c)
    # drop2: p = 0.0 -> identity
    o_ref[...] = y.astype(o_ref.dtype)


@functools.partial(jax.jit, static_argnames=("tile_m", "compute_dtype"))
def mlp_pallas(x, w1_torch, w2_torch, *, tile_m=512, compute_dtype=jnp.bfloat16):
    """x: [B, N, D_in]; w1_torch: [H, D_in]; w2_torch: [D_out, H] (torch layout)."""
    B, N, D_in = x.shape
    H = w1_torch.shape[0]
    D_out = w2_torch.shape[0]
    M = B * N

    vmem_limit = _vmem_limit_bytes()

    # Hoisted weight parametrization (one small Pallas call per weight), then
    # cast to the MXU compute dtype (bf16 halves weight DMA/VMEM footprint).
    # For inference these can be computed once and cached by the caller.
    w1_t = _positive_norm_t(w1_torch.T, compute_dtype, vmem_limit)  # [D_in, H]
    w2_t = _positive_norm_t(w2_torch.T, compute_dtype, vmem_limit)  # [H, D_out]

    x_flat = x.reshape(M, D_in)  # native dtype; cast happens inside the kernel

    # Row tiling: full-M single block for small M, else tile_m rows per step
    # (M > tile_m guarantees >= 2 blocks, so v7x can shard the parallel axis).
    tm = M if M <= tile_m else tile_m
    grid_m = _cdiv(M, tm)
    M_pad = grid_m * tm
    if M_pad != M:  # rare ragged tail; tile-aligned M pays nothing
        x_flat = jnp.pad(x_flat, ((0, M_pad - M), (0, 0)))

    h_block = _choose_hidden_block(H)

    out = pl.pallas_call(
        functools.partial(_mlp_kernel, h_block=h_block),
        out_shape=jax.ShapeDtypeStruct((M_pad, D_out), x.dtype),
        grid_spec=pltpu.PrefetchScalarGridSpec(
            num_scalar_prefetch=0,
            grid=(grid_m,),
            in_specs=[
                pl.BlockSpec((tm, D_in), lambda i: (i, 0)),
                # Constant block index -> Pallas skips re-DMA across steps.
                pl.BlockSpec((D_in, H), lambda i: (0, 0)),
                pl.BlockSpec((H, D_out), lambda i: (0, 0)),
            ],
            out_specs=pl.BlockSpec((tm, D_out), lambda i: (i, 0)),
        ),
        compiler_params=pltpu.CompilerParams(
            dimension_semantics=("parallel",),
            vmem_limit_bytes=vmem_limit,
        ),
    )(x_flat, w1_t, w2_t)

    if M_pad != M:
        out = out[:M]
    return out.reshape(B, N, D_out)


# ---------------------------------------------------------------------------
# Pure-JAX reference mirroring the PyTorch module.
# ---------------------------------------------------------------------------
def _mlp_reference(x, w1_torch, w2_torch):
    def positive_norm(w):  # relu + L1-normalize over dim=-1 (input dim)
        w = jnp.maximum(w, 0.0)
        return w / jnp.maximum(jnp.sum(w, axis=-1, keepdims=True), _EPS)

    w1 = positive_norm(w1_torch)
    w2 = positive_norm(w2_torch)
    h = x @ w1.T
    h = 0.5 * h * (1.0 + lax.erf(h / jnp.sqrt(2.0)))
    return h @ w2.T


if __name__ == "__main__":
    # small shapes: batch=2, seq=8, in_features=32, hidden_features=64
    B, N, D_in, H = 2, 8, 32, 64
    D_out = D_in  # out_features defaults to in_features

    key = jax.random.PRNGKey(0)
    kx, k1, k2 = jax.random.split(key, 3)
    x = jax.random.normal(kx, (B, N, D_in), dtype=jnp.float32)
    # deterministic synthetic parameters (torch nn.Linear layout: [out, in])
    w1 = jax.random.normal(k1, (H, D_in), dtype=jnp.float32) * 0.1
    w2 = jax.random.normal(k2, (D_out, H), dtype=jnp.float32) * 0.1

    y_ref = _mlp_reference(x, w1, w2)

    # f32 MXU-input path: strict check against the reference.
    y32 = jax.block_until_ready(mlp_pallas(x, w1, w2, compute_dtype=jnp.float32))
    assert y32.shape == (B, N, D_out)
    assert jnp.allclose(y32, y_ref, atol=1e-5, rtol=1e-5), "f32 path mismatch"

    # default bf16-input / f32-accumulate fast path (v5e/v6e/v7x MXU peak).
    y16 = jax.block_until_ready(mlp_pallas(x, w1, w2))
    assert y16.shape == (B, N, D_out)
    assert jnp.allclose(y16, y_ref, atol=1e-2, rtol=5e-2), "bf16 path mismatch"

    print("KERNEL_OK")
</pallas_src>

<mosaic_0001>
module attributes {stable_mosaic.version = 11 : i64} {
  func.func @_positive_norm_t_kernel(%arg0: i32, %arg1: memref<64x32xf32, #tpu.memory_space<vmem>>, %arg2: memref<64x32xf32, #tpu.memory_space<vmem>>) attributes {dimension_semantics = [#tpu.dimension_semantics<parallel>], iteration_bounds = array<i64: 1>, scalar_prefetch = 0 : i64, scratch_operands = 0 : i64, tpu.core_type = #tpu.core_type<tc>, window_params = [{transform_indices = @transform_0, window_bounds = array<i64: 64, 32>}, {transform_indices = @transform_1, window_bounds = array<i64: 64, 32>}]} {
    %c0 = arith.constant 0 : index
    %c0_0 = arith.constant 0 : index
    %0 = vector.load %arg1[%c0, %c0_0] : memref<64x32xf32, #tpu.memory_space<vmem>>, vector<64x32xf32>
    %cst = arith.constant 0.000000e+00 : f32
    %1 = vector.broadcast %cst : f32 to vector<64x32xf32>
    %2 = arith.maximumf %0, %1 : vector<64x32xf32>
    %cst_1 = arith.constant dense<0.000000e+00> : vector<32xf32>
    %3 = vector.multi_reduction <add>, %2, %cst_1 [0] : vector<64x32xf32> to vector<32xf32>
    %4 = vector.shape_cast %3 : vector<32xf32> to vector<1x32xf32>
    %cst_2 = arith.constant 9.99999996E-13 : f32
    %5 = vector.broadcast %cst_2 : f32 to vector<1x32xf32>
    %6 = arith.maximumf %4, %5 : vector<1x32xf32>
    %7 = vector.broadcast %6 : vector<1x32xf32> to vector<64x32xf32>
    %8 = arith.divf %2, %7 : vector<64x32xf32>
    %c0_3 = arith.constant 0 : index
    %c0_4 = arith.constant 0 : index
    %9 = vector.load %arg2[%c0_3, %c0_4] : memref<64x32xf32, #tpu.memory_space<vmem>>, vector<64x32xf32>
    tpu.vector_store %arg2[%c0_3, %c0_4], %8 {strides = array<i32>} : memref<64x32xf32, #tpu.memory_space<vmem>>, vector<64x32xf32>,
    return
  }
  func.func @transform_0(%arg0: i32) -> (i32, i32) {
    %c0_i32 = arith.constant 0 : i32
    %c0_i32_0 = arith.constant 0 : i32
    return %c0_i32, %arg0 : i32, i32
  }
  func.func @transform_1(%arg0: i32) -> (i32, i32) {
    %c0_i32 = arith.constant 0 : i32
    %c0_i32_0 = arith.constant 0 : i32
    return %c0_i32, %arg0 : i32, i32
  }
}

module attributes {stable_mosaic.version = 11 : i64} {
  func.func @_positive_norm_t_kernel(%arg0: i32, %arg1: memref<32x64xf32, #tpu.memory_space<vmem>>, %arg2: memref<32x64xf32, #tpu.memory_space<vmem>>) attributes {dimension_semantics = [#tpu.dimension_semantics<parallel>], iteration_bounds = array<i64: 1>, scalar_prefetch = 0 : i64, scratch_operands = 0 : i64, tpu.core_type = #tpu.core_type<tc>, window_params = [{transform_indices = @transform_0, window_bounds = array<i64: 32, 64>}, {transform_indices = @transform_1, window_bounds = array<i64: 32, 64>}]} {
    %c0 = arith.constant 0 : index
    %c0_0 = arith.constant 0 : index
    %0 = vector.load %arg1[%c0, %c0_0] : memref<32x64xf32, #tpu.memory_space<vmem>>, vector<32x64xf32>
    %cst = arith.constant 0.000000e+00 : f32
    %1 = vector.broadcast %cst : f32 to vector<32x64xf32>
    %2 = arith.maximumf %0, %1 : vector<32x64xf32>
    %cst_1 = arith.constant dense<0.000000e+00> : vector<64xf32>
    %3 = vector.multi_reduction <add>, %2, %cst_1 [0] : vector<32x64xf32> to vector<64xf32>
    %4 = vector.shape_cast %3 : vector<64xf32> to vector<1x64xf32>
    %cst_2 = arith.constant 9.99999996E-13 : f32
    %5 = vector.broadcast %cst_2 : f32 to vector<1x64xf32>
    %6 = arith.maximumf %4, %5 : vector<1x64xf32>
    %7 = vector.broadcast %6 : vector<1x64xf32> to vector<32x64xf32>
    %8 = arith.divf %2, %7 : vector<32x64xf32>
    %c0_3 = arith.constant 0 : index
    %c0_4 = arith.constant 0 : index
    %9 = vector.load %arg2[%c0_3, %c0_4] : memref<32x64xf32, #tpu.memory_space<vmem>>, vector<32x64xf32>
    tpu.vector_store %arg2[%c0_3, %c0_4], %8 {strides = array<i32>} : memref<32x64xf32, #tpu.memory_space<vmem>>, vector<32x64xf32>,
    return
  }
  func.func @transform_0(%arg0: i32) -> (i32, i32) {
    %c0_i32 = arith.constant 0 : i32
    %c0_i32_0 = arith.constant 0 : i32
    return %c0_i32, %arg0 : i32, i32
  }
  func.func @transform_1(%arg0: i32) -> (i32, i32) {
    %c0_i32 = arith.constant 0 : i32
    %c0_i32_0 = arith.constant 0 : i32
    return %c0_i32, %arg0 : i32, i32
  }
}

module attributes {stable_mosaic.version = 11 : i64} {
  func.func @_mlp_kernel(%arg0: i32, %arg1: memref<16x32xf32, #tpu.memory_space<vmem>>, %arg2: memref<32x64xf32, #tpu.memory_space<vmem>>, %arg3: memref<64x32xf32, #tpu.memory_space<vmem>>, %arg4: memref<16x32xf32, #tpu.memory_space<vmem>>) attributes {dimension_semantics = [#tpu.dimension_semantics<parallel>], iteration_bounds = array<i64: 1>, scalar_prefetch = 0 : i64, scratch_operands = 0 : i64, tpu.core_type = #tpu.core_type<tc>, window_params = [{transform_indices = @transform_0, window_bounds = array<i64: 16, 32>}, {pipeline_mode = #tpu.pipeline_mode<synchronous>, transform_indices = @transform_1, window_bounds = array<i64: 32, 64>}, {pipeline_mode = #tpu.pipeline_mode<synchronous>, transform_indices = @transform_2, window_bounds = array<i64: 64, 32>}, {transform_indices = @transform_3, window_bounds = array<i64: 16, 32>}]} {
    %c0 = arith.constant 0 : index
    %c0_0 = arith.constant 0 : index
    %0 = vector.load %arg1[%c0, %c0_0] : memref<16x32xf32, #tpu.memory_space<vmem>>, vector<16x32xf32>
    %c0_1 = arith.constant 0 : index
    %c0_2 = arith.constant 0 : index
    %1 = vector.load %arg2[%c0_1, %c0_2] : memref<32x64xf32, #tpu.memory_space<vmem>>, vector<32x64xf32>
    %cst = arith.constant dense<0.000000e+00> : vector<16x64xf32>
    %2 = tpu.matmul %0, %1, %cst {dimension_numbers = #tpu.dot_dimension_numbers<[1], [0], [0], [1], [0, 0, 1, 1], [], []>} : vector<16x32xf32>, vector<32x64xf32>, vector<16x64xf32> -> vector<16x64xf32>
    %cst_3 = arith.constant 5.000000e-01 : f32
    %3 = vector.broadcast %cst_3 : f32 to vector<16x64xf32>
    %4 = arith.mulf %3, %2 : vector<16x64xf32>
    %cst_4 = arith.constant 0.707106769 : f32
    %5 = vector.broadcast %cst_4 : f32 to vector<16x64xf32>
    %6 = arith.mulf %2, %5 : vector<16x64xf32>
    %7 = math.erf %6 : vector<16x64xf32>
    %cst_5 = arith.constant 1.000000e+00 : f32
    %8 = vector.broadcast %cst_5 : f32 to vector<16x64xf32>
    %9 = arith.addf %8, %7 : vector<16x64xf32>
    %10 = arith.mulf %4, %9 : vector<16x64xf32>
    %c0_6 = arith.constant 0 : index
    %c0_7 = arith.constant 0 : index
    %11 = vector.load %arg3[%c0_6, %c0_7] : memref<64x32xf32, #tpu.memory_space<vmem>>, vector<64x32xf32>
    %cst_8 = arith.constant dense<0.000000e+00> : vector<16x32xf32>
    %12 = tpu.matmul %10, %11, %cst_8 {dimension_numbers = #tpu.dot_dimension_numbers<[1], [0], [0], [1], [0, 0, 1, 1], [], []>} : vector<16x64xf32>, vector<64x32xf32>, vector<16x32xf32> -> vector<16x32xf32>
    %c0_9 = arith.constant 0 : index
    %c0_10 = arith.constant 0 : index
    %13 = vector.load %arg4[%c0_9, %c0_10] : memref<16x32xf32, #tpu.memory_space<vmem>>, vector<16x32xf32>
    tpu.vector_store %arg4[%c0_9, %c0_10], %12 {strides = array<i32>} : memref<16x32xf32, #tpu.memory_space<vmem>>, vector<16x32xf32>,
    return
  }
  func.func @transform_0(%arg0: i32) -> (i32, i32) {
    %c0_i32 = arith.constant 0 : i32
    %c0_i32_0 = arith.constant 0 : i32
    return %arg0, %c0_i32 : i32, i32
  }
  func.func @transform_1(%arg0: i32) -> (i32, i32) {
    %c0_i32 = arith.constant 0 : i32
    %c0_i32_0 = arith.constant 0 : i32
    %c0_i32_1 = arith.constant 0 : i32
    return %c0_i32, %c0_i32_0 : i32, i32
  }
  func.func @transform_2(%arg0: i32) -> (i32, i32) {
    %c0_i32 = arith.constant 0 : i32
    %c0_i32_0 = arith.constant 0 : i32
    %c0_i32_1 = arith.constant 0 : i32
    return %c0_i32, %c0_i32_0 : i32, i32
  }
  func.func @transform_3(%arg0: i32) -> (i32, i32) {
    %c0_i32 = arith.constant 0 : i32
    %c0_i32_0 = arith.constant 0 : i32
    return %arg0, %c0_i32 : i32, i32
  }
}

</mosaic_0001>

<bundles_post_ra>
// kernel: mlp_pallas.5
= control target key start
LH: loop header
LB: loop body
LE: loop exit
PB: predicated region body
PF: predicated region fallthrough
CT: control target
= control target key end

     0   :  { %s350_s0 = inlined_call_operand.vmem [shape: f32[16,32], index: 0, kind: input, shape index: {}]   ;;  %s351_s1 = inlined_call_operand.vmem [shape: f32[32,64], index: 1, kind: input, shape index: {}]   ;;  %s352_s2 = inlined_call_operand.vmem [shape: f32[64,32], index: 2, kind: input, shape index: {}]   ;;  %s353_s3 = inlined_call_operand.hbm [shape: f32[16,32], index: 3, kind: output, shape index: {}]  }
   0x1   :  { %v20_v0 = vld [vmem:[%s351_s1 + $0x18] sm:$0xff]  ;;  %v19_v1 = vld [vmem:[%s351_s1 + $0x10] sm:$0xff]  ;;  %v18_v2 = vld [vmem:[%s351_s1 + $0x8] sm:$0xff] }
   0x2   :  { %40 = vmatpush.msra.mxu0 %v20_v0  ;;  %203 = vmatpush.msra.mxu3 %v20_v0 }
   0x3   :  { %8 = vsyncpa [#allocation3], 0  ;;  %v17_v3 = vld [vmem:[%s351_s1] sm:$0xff]  ;;  %vm21_vm0 = vcmask 261120   ;;  %v16_v5 = vld [vmem:[%s350_s0 + $0x8] sm:$0xff]  ;;  %vm147_vm9 = vcmask 523264  }
   0x4   :  { %41 = vmatpush.msra.mxu0 %v19_v1  ;;  %204 = vmatpush.msra.mxu3 %v19_v1  ;;  %v15_v4 = vld [vmem:[%s350_s0] sm:$0xff]  ;;  %v146_v11 = vld [vmem:[%s352_s2 + $0x38] sm:$0xff]  ;;  %v145_v15 = vld [vmem:[%s352_s2 + $0x30] sm:$0xff]  ;;  %s185_s14 = sshll.u32 %s353_s3, 4  ;;  %s249_s15 = smov 128   ;;  %s186_s14 = int_to_ptr.hbm [resolvable:$true] %s185_s14 }
   0x5   :  { %162 = vmatpush.msra.mxu1 %v146_v11  ;;  %207 = vmatpush.msra.mxu2 %v146_v11  ;;  %v144_v19 = vld [vmem:[%s352_s2 + $0x28] sm:$0xff]  ;;  %v143_v23 = vld [vmem:[%s352_s2 + $0x20] sm:$0xff]  ;;  %v142_v28 = vld [vmem:[%s352_s2 + $0x18] sm:$0xff]  ;;  %s250_s16 = smov 8  }
   0x6   :  { %42 = vmatpush.msra.mxu0 %v18_v2  ;;  %205 = vmatpush.msra.mxu3 %v18_v2  ;;  %v141_v32 = vld [vmem:[%s352_s2 + $0x10] sm:$0xff]  ;;  %v140_v37 = vld [vmem:[%s352_s2 + $0x8] sm:$0xff]  ;;  %v139_v40 = vld [vmem:[%s352_s2] sm:$0xff]  ;;  %s248_s2 = smov [#allocation2]  }
   0x7   :  { %163 = vmatpush.msra.mxu1 %v145_v15  ;;  %208 = vmatpush.msra.mxu2 %v145_v15  ;;  %s183_s11 = sshll.u32 %s248_s2, 4  ;;  %s184_s11 = int_to_ptr.vmem [resolvable:$true] %s183_s11 }
   0x8   :  { %43 = vmatpush.msra.mxu0 %v17_v3  ;;  %206 = vmatpush.msra.mxu3 %v17_v3 }
   0x9   :  { %197 = vmatmul.msk.f32.vlgmr.msra.gmra.mxu0 %vm21_vm0, %v15_v4  ;;  %198 = vmatmul.msk.f32.vlgmr.msra.gmra.mxu3 %vm21_vm0, %v16_v5 }
   0xa   :  { %164 = vmatpush.msra.mxu1 %v144_v19  ;;  %209 = vmatpush.msra.mxu2 %v144_v19 }
   0xc   :  { %165 = vmatpush.msra.mxu1 %v143_v23  ;;  %210 = vmatpush.msra.mxu2 %v143_v23 }
   0xe   :  { %166 = vmatpush.msra.mxu1 %v142_v28  ;;  %211 = vmatpush.msra.mxu2 %v142_v28 }
  0x10   :  { %167 = vmatpush.msra.mxu1 %v141_v32  ;;  %212 = vmatpush.msra.mxu2 %v141_v32 }
  0x12   :  { %168 = vmatpush.msra.mxu1 %v140_v37  ;;  %213 = vmatpush.msra.mxu2 %v140_v37 }
  0x14   :  { %169 = vmatpush.msra.mxu1 %v139_v40  ;;  %214 = vmatpush.msra.mxu2 %v139_v40 }
  0x86   :  { %v291_v6 = vpop.f32.mrf.mxu0 }
  0x87   :  { %v294_v7 = vmul.f32 0.70710677, %v291_v6  ;;  %v51_v23 = vmul.f32 0.5, %v291_v6 }
  0x89   :  { %v55_v8 = vmul.f32 %v294_v7, %v294_v7 }
  0x8b   :  { %v298_v9 = vmin.f32 %v55_v8, 16.0 }
  0x8c   :  { %v300_v10 = vpop.f32.mrf.mxu3 }
  0x8d   :  { %v57_v12 = vmul.f32 2.1237322e-06, %v298_v9  ;;  %v68_v13 = vmul.f32 3.8918573e-05, %v298_v9  ;;  %v308_v14 = vmul.f32 0.70710677, %v300_v10 }
  0x8f   :  { %v58_v16 = vadd.f32 0.00028619796, %v57_v12  ;;  %v69_v17 = vadd.f32 0.001143296, %v68_v13  ;;  %v95_v18 = vmul.f32 %v308_v14, %v308_v14 }
  0x91   :  { %v59_v20 = vmul.f32 %v58_v16, %v298_v9  ;;  %v70_v21 = vmul.f32 %v69_v17, %v298_v9  ;;  %v96_v22 = vmin.f32 %v95_v18, 16.0 }
  0x93   :  { %v60_v24 = vadd.f32 0.0036580483, %v59_v20  ;;  %v71_v25 = vadd.f32 0.014752088, %v70_v21  ;;  %v97_v26 = vmul.f32 2.1237322e-06, %v96_v22 }
  0x94   :  { %v108_v27 = vmul.f32 3.8918573e-05, %v96_v22 }
  0x95   :  { %v72_v29 = vmul.f32 %v71_v25, %v298_v9  ;;  %v98_v30 = vadd.f32 0.00028619796, %v97_v26  ;;  %v61_v34 = vmul.f32 %v60_v24, %v298_v9 }
  0x96   :  { %v109_v31 = vadd.f32 0.001143296, %v108_v27 }
  0x97   :  { %v73_v33 = vadd.f32 0.112945676, %v72_v29  ;;  %v99_v35 = vmul.f32 %v98_v30, %v96_v22  ;;  %v62_v43 = vadd.f32 0.05243302, %v61_v34  ;;  %v52_v30 = vmul.f32 0.5, %v300_v10 }
  0x98   :  { %v110_v36 = vmul.f32 %v109_v31, %v96_v22 }
  0x99   :  { %v74_v38 = vmul.f32 %v73_v33, %v298_v9  ;;  %v100_v42 = vadd.f32 0.0036580483, %v99_v35  ;;  %v63_v49 = vmul.f32 %v62_v43, %v298_v9 }
  0x9a   :  { %v111_v39 = vadd.f32 0.014752088, %v110_v36 }
  0x9b   :  { %v75_v41 = vadd.f32 0.4994258, %v74_v38  ;;  %v101_v48 = vmul.f32 %v100_v42, %v96_v22  ;;  %v64_v53 = vadd.f32 0.18741608, %v63_v49 }
  0x9c   :  { %v112_v44 = vmul.f32 %v111_v39, %v96_v22 }
  0x9d   :  { %v76_v45 = vmul.f32 %v75_v41, %v298_v9  ;;  %v102_v52 = vadd.f32 0.05243302, %v101_v48  ;;  %v65_v58 = vmul.f32 %v64_v53, %v298_v9 }
  0x9e   :  { %v113_v46 = vadd.f32 0.112945676, %v112_v44 }
  0x9f   :  { %v77_v47 = vadd.f32 1.0, %v76_v45  ;;  %v103_v57 = vmul.f32 %v102_v52, %v96_v22  ;;  %v66_v63 = vadd.f32 1.1283791, %v65_v58 }
  0xa0   :  { %v114_v50 = vmul.f32 %v113_v46, %v96_v22 }
  0xa1   :  { %218 = vrcp.f32 %v77_v47  ;;  %v89_v61 = vand.u32 2147483648, %v77_v47  ;;  %v104_v62 = vadd.f32 0.18741608, %v103_v57  ;;  %v87_v1 = vand.u32 2147483647, %v77_v47 }
  0xa2   :  { %v115_v51 = vadd.f32 0.4994258, %v114_v50  ;;  %vm83_vm2 = vweird.f32 %v77_v47  ;;  %v67_v11 = vmul.f32 %v66_v63, %v294_v7 }
  0xa3   :  { %v90_v4 = vor.u32 1.1754944e-38, %v89_v61  ;;  %v105_v5 = vmul.f32 %v104_v62, %v96_v22  ;;  %vm88_vm4 = vcmp.eq.f32.partialorder %v87_v1, 8.507059e+37 }
  0xa4   :  { %v116_v54 = vmul.f32 %v115_v51, %v96_v22 }
  0xa5   :  { %v106_v17 = vadd.f32 1.1283791, %v105_v5 }
  0xa6   :  { %v117_v55 = vadd.f32 1.0, %v116_v54 }
  0xa7   :  { %v219_v56 = vpop.eup %218  ;;  %v107_v7 = vmul.f32 %v106_v17, %v308_v14 }
  0xa8   :  { %v79_v59 = vmul.f32 %v219_v56, %v77_v47  ;;  %220 = vrcp.f32 %v117_v55  ;;  %vm84_vm1 = vweird.f32 %v219_v56  ;;  %v129_v16 = vand.u32 2147483648, %v117_v55 }
  0xa9   :  { %vm85_vm3 = vmor %vm83_vm2, %vm84_vm1  ;;  %v127_v19 = vand.u32 2147483647, %v117_v55  ;;  %vm123_vm6 = vweird.f32 %v117_v55 }
  0xaa   :  { %v80_v60 = vsub.f32 1.0, %v79_v59  ;;  %v130_v22 = vor.u32 1.1754944e-38, %v129_v16 }
  0xab   :  { %vm128_vm8 = vcmp.eq.f32.partialorder %v127_v19, 8.507059e+37 }
  0xac   :  { %v81_v0 = vmul.f32 %v219_v56, %v80_v60 }
  0xae   :  { %v221_v2 = vpop.eup %220  ;;  %v82_v3 = vadd.f32 %v219_v56, %v81_v0 }
  0xaf   :  { %v119_v8 = vmul.f32 %v221_v2, %v117_v55  ;;  %vm124_vm5 = vweird.f32 %v221_v2 }
  0xb0   :  { %v86_v12 = vsel %vm85_vm3, %v219_v56, %v82_v3  ;;  %vm125_vm7 = vmor %vm123_vm6, %vm124_vm5 }
  0xb1   :  { %v91_v9 = vsel %vm88_vm4, %v90_v4, %v86_v12  ;;  %v120_v13 = vsub.f32 1.0, %v119_v8 }
  0xb2   :  { %v92_v15 = vmul.f32 %v91_v9, %v67_v11 }
  0xb3   :  { %v121_v18 = vmul.f32 %v221_v2, %v120_v13 }
  0xb4   :  { %v199_v20 = vclamps-f32 %v92_v15, 1.0 }
  0xb5   :  { %v122_v21 = vadd.f32 %v221_v2, %v121_v18 }
  0xb6   :  { %v135_v24 = vadd.f32 1.0, %v199_v20 }
  0xb7   :  { %v126_v25 = vsel %vm125_vm7, %v221_v2, %v122_v21 }
  0xb8   :  { %v137_v26 = vmul.f32 %v135_v24, %v51_v23  ;;  %v131_v27 = vsel %vm128_vm8, %v130_v22, %v126_v25 }
  0xb9   :  { %v132_v28 = vmul.f32 %v131_v27, %v107_v7 }
  0xba   :  { %201 = vmatmul.msk.f32.vlgmr.msra.gmra.mxu1 %vm147_vm9, %v137_v26 }
  0xbb   :  { %v200_v29 = vclamps-f32 %v132_v28, 1.0 }
  0xbd   :  { %v136_v31 = vadd.f32 1.0, %v200_v29 }
  0xbf   :  { %v138_v32 = vmul.f32 %v136_v31, %v52_v30 }
  0xc1   :  { %202 = vmatmul.msk.f32.vlgmr.msra.gmra.mxu2 %vm147_vm9, %v138_v32 }
 0x137   :  { %v171_v33 = vpop.f32.mrf.mxu1 }
 0x138   :  { %177 = vst.msk [vmem:[#allocation2] sm:$0xff] %vm21_vm0, %v171_v33 }
 0x144   :  { %v174_v6 = vpop.f32.mrf.mxu2 }
 0x145   :  { %178 = vst.msk [vmem:[#allocation2 + $0x8] sm:$0xff] %vm21_vm0, %v174_v6 }
 0x146   :  { %191 = dma.vmem_to_hbm [thread:$0]  %s184_s11, 256, %s186_s14, [#allocation3], %s249_s15, %s249_s15, %s250_s16  }
 0x147   :  { %246 = dma.done.wait [#allocation3], 256  }
 0x148   :  { %247 = vsyncadd [#allocation3], 4294967040 }
 0x149   :  { %196 = vsyncpa [#allocation3], 1 }

// kernel: mlp_pallas.3
= control target key start
LH: loop header
LB: loop body
LE: loop exit
PB: predicated region body
PF: predicated region fallthrough
CT: control target
= control target key end

     0   :  { %vm16_vm0 = vcmask 523264   ;;  %s101_s0 = inlined_call_operand.vmem [shape: f32[32,64], index: 0, kind: input, shape index: {}]   ;;  %s102_s1 = inlined_call_operand.vmem [shape: f32[32,64], index: 1, kind: output, shape index: {}]  }
   0x1   :  { %v8_v0 = vld [vmem:[%s101_s0] sm:$0xff]  ;;  %v9_v1 = vld [vmem:[%s101_s0 + $0x8] sm:$0xff]  ;;  %v10_v2 = vld [vmem:[%s101_s0 + $0x10] sm:$0xff] }
   0x2   :  { %v11_v3 = vld [vmem:[%s101_s0 + $0x18] sm:$0xff]  ;;  %v12_v4 = vmax.f32 %v8_v0, 0.0  ;;  %v13_v5 = vmax.f32 %v9_v1, 0.0  ;;  %v14_v6 = vmax.f32 %v10_v2, 0.0 }
   0x3   :  { %v15_v7 = vmax.f32 %v11_v3, 0.0 }
   0x4   :  { %v17_v8 = vsel %vm16_vm0, %v12_v4, 0.0  ;;  %v18_v9 = vsel %vm16_vm0, %v13_v5, 0.0  ;;  %v20_v10 = vsel %vm16_vm0, %v14_v6, 0.0 }
   0x5   :  { %v19_v11 = vadd.f32 %v18_v9, %v17_v8  ;;  %v22_v12 = vsel %vm16_vm0, %v15_v7, 0.0 }
   0x7   :  { %v21_v13 = vadd.f32 %v20_v10, %v19_v11 }
   0x9   :  { %v23_v14 = vadd.f32 %v22_v12, %v21_v13 }
   0xb   :  { %v24_v15 = vrot.slane %v23_v14, 4 }
   0xd   :  { %v25_v16 = vadd.f32 %v24_v15, %v23_v14 }
   0xf   :  { %v26_v17 = vrot.slane %v25_v16, 2 }
  0x11   :  { %v27_v18 = vadd.f32 %v26_v17, %v25_v16 }
  0x13   :  { %v28_v19 = vrot.slane %v27_v18, 1 }
  0x15   :  { %v29_v20 = vadd.f32 %v28_v19, %v27_v18 }
  0x17   :  { %v30_v21 = vmax.f32 %v29_v20, 1e-12 }
  0x19   :  { %57 = vrcp.f32 %v30_v21  ;;  %v42_v24 = vand.u32 2147483648, %v30_v21  ;;  %vm36_vm1 = vweird.f32 %v30_v21  ;;  %v40_v26 = vand.u32 2147483647, %v30_v21 }
  0x1b   :  { %v43_v28 = vor.u32 1.1754944e-38, %v42_v24  ;;  %vm41_vm4 = vcmp.eq.f32.partialorder %v40_v26, 8.507059e+37 }
  0x1f   :  { %v58_v22 = vpop.eup %57 }
  0x20   :  { %v32_v23 = vmul.f32 %v58_v22, %v30_v21  ;;  %vm37_vm2 = vweird.f32 %v58_v22 }
  0x21   :  { %vm38_vm3 = vmor %vm36_vm1, %vm37_vm2 }
  0x22   :  { %v33_v25 = vsub.f32 1.0, %v32_v23 }
  0x24   :  { %v34_v27 = vmul.f32 %v58_v22, %v33_v25 }
  0x26   :  { %v35_v29 = vadd.f32 %v58_v22, %v34_v27 }
  0x28   :  { %v39_v30 = vsel %vm38_vm3, %v58_v22, %v35_v29 }
  0x29   :  { %v44_v31 = vsel %vm41_vm4, %v43_v28, %v39_v30 }
  0x2a   :  { %v45_v32 = vmul.f32 %v44_v31, %v12_v4  ;;  %v46_v33 = vmul.f32 %v44_v31, %v13_v5  ;;  %v47_v34 = vmul.f32 %v44_v31, %v14_v6  ;;  %v48_v35 = vmul.f32 %v44_v31, %v15_v7 }
  0x2c   :  { %49 = vst.msk [vmem:[%s102_s1] sm:$0xff] %vm16_vm0, %v45_v32 }
  0x2d   :  { %50 = vst.msk [vmem:[%s102_s1 + $0x8] sm:$0xff] %vm16_vm0, %v46_v33 }
  0x2e   :  { %51 = vst.msk [vmem:[%s102_s1 + $0x10] sm:$0xff] %vm16_vm0, %v47_v34 }
  0x2f   :  { %52 = vst.msk [vmem:[%s102_s1 + $0x18] sm:$0xff] %vm16_vm0, %v48_v35 }

// kernel: mlp_pallas.4
= control target key start
LH: loop header
LB: loop body
LE: loop exit
PB: predicated region body
PF: predicated region fallthrough
CT: control target
= control target key end

     0   :  { %vm24_vm0 = vcmask 261120   ;;  %s157_s0 = inlined_call_operand.vmem [shape: f32[64,32], index: 0, kind: input, shape index: {}]   ;;  %s158_s1 = inlined_call_operand.vmem [shape: f32[64,32], index: 1, kind: output, shape index: {}]  }
   0x1   :  { %v8_v0 = vld [vmem:[%s157_s0] sm:$0xff]  ;;  %v9_v1 = vld [vmem:[%s157_s0 + $0x8] sm:$0xff]  ;;  %v10_v2 = vld [vmem:[%s157_s0 + $0x10] sm:$0xff] }
   0x2   :  { %v11_v3 = vld [vmem:[%s157_s0 + $0x18] sm:$0xff]  ;;  %v12_v4 = vld [vmem:[%s157_s0 + $0x20] sm:$0xff]  ;;  %v16_v5 = vmax.f32 %v8_v0, 0.0  ;;  %v17_v6 = vmax.f32 %v9_v1, 0.0  ;;  %v18_v7 = vmax.f32 %v10_v2, 0.0  ;;  %v13_v8 = vld [vmem:[%s157_s0 + $0x28] sm:$0xff] }
   0x3   :  { %v19_v9 = vmax.f32 %v11_v3, 0.0  ;;  %v20_v10 = vmax.f32 %v12_v4, 0.0  ;;  %v14_v13 = vld [vmem:[%s157_s0 + $0x30] sm:$0xff]  ;;  %v21_v16 = vmax.f32 %v13_v8, 0.0  ;;  %v15_v18 = vld [vmem:[%s157_s0 + $0x38] sm:$0xff] }
   0x4   :  { %v25_v11 = vsel %vm24_vm0, %v16_v5, 0.0  ;;  %v26_v12 = vsel %vm24_vm0, %v17_v6, 0.0  ;;  %v28_v15 = vsel %vm24_vm0, %v18_v7, 0.0  ;;  %v22_v20 = vmax.f32 %v14_v13, 0.0 }
   0x5   :  { %v27_v14 = vadd.f32 %v26_v12, %v25_v11  ;;  %v30_v17 = vsel %vm24_vm0, %v19_v9, 0.0  ;;  %v32_v21 = vsel %vm24_vm0, %v20_v10, 0.0  ;;  %v23_v23 = vmax.f32 %v15_v18, 0.0 }
   0x6   :  { %v34_v24 = vsel %vm24_vm0, %v21_v16, 0.0  ;;  %v36_v26 = vsel %vm24_vm0, %v22_v20, 0.0 }
   0x7   :  { %v29_v19 = vadd.f32 %v28_v15, %v27_v14  ;;  %v38_v28 = vsel %vm24_vm0, %v23_v23, 0.0 }
   0x9   :  { %v31_v22 = vadd.f32 %v30_v17, %v29_v19 }
   0xb   :  { %v33_v25 = vadd.f32 %v32_v21, %v31_v22 }
   0xd   :  { %v35_v27 = vadd.f32 %v34_v24, %v33_v25 }
   0xf   :  { %v37_v29 = vadd.f32 %v36_v26, %v35_v27 }
  0x11   :  { %v39_v30 = vadd.f32 %v38_v28, %v37_v29 }
  0x13   :  { %v40_v31 = vrot.slane %v39_v30, 4 }
  0x15   :  { %v41_v32 = vadd.f32 %v40_v31, %v39_v30 }
  0x17   :  { %v42_v33 = vrot.slane %v41_v32, 2 }
  0x19   :  { %v43_v34 = vadd.f32 %v42_v33, %v41_v32 }
  0x1b   :  { %v44_v35 = vrot.slane %v43_v34, 1 }
  0x1d   :  { %v45_v36 = vadd.f32 %v44_v35, %v43_v34 }
  0x1f   :  { %v46_v37 = vmax.f32 %v45_v36, 1e-12 }
  0x21   :  { %81 = vrcp.f32 %v46_v37  ;;  %v58_v40 = vand.u32 2147483648, %v46_v37  ;;  %vm52_vm1 = vweird.f32 %v46_v37  ;;  %v56_v42 = vand.u32 2147483647, %v46_v37 }
  0x23   :  { %v59_v44 = vor.u32 1.1754944e-38, %v58_v40  ;;  %vm57_vm4 = vcmp.eq.f32.partialorder %v56_v42, 8.507059e+37 }
  0x27   :  { %v82_v38 = vpop.eup %81 }
  0x28   :  { %v48_v39 = vmul.f32 %v82_v38, %v46_v37  ;;  %vm53_vm2 = vweird.f32 %v82_v38 }
  0x29   :  { %vm54_vm3 = vmor %vm52_vm1, %vm53_vm2 }
  0x2a   :  { %v49_v41 = vsub.f32 1.0, %v48_v39 }
  0x2c   :  { %v50_v43 = vmul.f32 %v82_v38, %v49_v41 }
  0x2e   :  { %v51_v45 = vadd.f32 %v82_v38, %v50_v43 }
  0x30   :  { %v55_v46 = vsel %vm54_vm3, %v82_v38, %v51_v45 }
  0x31   :  { %v60_v47 = vsel %vm57_vm4, %v59_v44, %v55_v46 }
  0x32   :  { %v61_v48 = vmul.f32 %v60_v47, %v16_v5  ;;  %v62_v49 = vmul.f32 %v60_v47, %v17_v6  ;;  %v63_v50 = vmul.f32 %v60_v47, %v18_v7  ;;  %v64_v51 = vmul.f32 %v60_v47, %v19_v9 }
  0x33   :  { %v65_v52 = vmul.f32 %v60_v47, %v20_v10  ;;  %v66_v53 = vmul.f32 %v60_v47, %v21_v16  ;;  %v67_v54 = vmul.f32 %v60_v47, %v22_v20  ;;  %v68_v55 = vmul.f32 %v60_v47, %v23_v23 }
  0x34   :  { %69 = vst.msk [vmem:[%s158_s1] sm:$0xff] %vm24_vm0, %v61_v48 }
  0x35   :  { %70 = vst.msk [vmem:[%s158_s1 + $0x8] sm:$0xff] %vm24_vm0, %v62_v49 }
  0x36   :  { %71 = vst.msk [vmem:[%s158_s1 + $0x10] sm:$0xff] %vm24_vm0, %v63_v50 }
  0x37   :  { %72 = vst.msk [vmem:[%s158_s1 + $0x18] sm:$0xff] %vm24_vm0, %v64_v51 }
  0x38   :  { %73 = vst.msk [vmem:[%s158_s1 + $0x20] sm:$0xff] %vm24_vm0, %v65_v52 }
  0x39   :  { %74 = vst.msk [vmem:[%s158_s1 + $0x28] sm:$0xff] %vm24_vm0, %v66_v53 }
  0x3a   :  { %75 = vst.msk [vmem:[%s158_s1 + $0x30] sm:$0xff] %vm24_vm0, %v67_v54 }
  0x3b   :  { %76 = vst.msk [vmem:[%s158_s1 + $0x38] sm:$0xff] %vm24_vm0, %v68_v55 }

</bundles_post_ra>
